<compile_context>
chip_gen: v6e
topology: v6e:2x2x1
jax: 0.10.0
libtpu: 0.0.40
codegen_flags: <defaults>
</compile_context>

<pallas_src>
import numpy as np
import jax
import jax.numpy as jnp
from jax.experimental import pallas as pl
from jax.experimental.pallas import tpu as pltpu

# ---------------- module hyper-parameters (mirror GeneratorPosEncoding.__init__) ----
Z_DIM = 8                                   # params['z_dim']
COND_KEYS = ["X", "Y", "Z", "dX", "dY", "dZ"]
COND_DIM = len(COND_KEYS)                   # 6
X_DIM = 12                                  # params['x_dim']
OUT_DIM = X_DIM - COND_DIM                  # 6
G_DIM = 32                                  # params['g_dim']
G_LAYERS = 2                                # params['g_layers'] (hard-wired below)
BLOCK_LEN = 3                               # positional_encoding = "X 3 dX 3"
NUM_PE_BLOCKS = 2
NUM_ENC = 4                                 # num_encoding_functions
INCLUDE_INPUT = True
LOG_SAMPLING = True

if LOG_SAMPLING:
    FREQS = tuple(float(2.0 ** i) for i in range(NUM_ENC))          # 1, 2, 4, 8
else:
    FREQS = tuple(float(f) for f in np.linspace(1.0, 2.0 ** (NUM_ENC - 1), NUM_ENC))

PIECES_PER_BLOCK = (1 if INCLUDE_INPUT else 0) + 2 * NUM_ENC   # 9
PE_BLOCK_DIM = BLOCK_LEN * PIECES_PER_BLOCK                    # 27
PE_DIM = Z_DIM + NUM_PE_BLOCKS * PE_BLOCK_DIM                  # 62 (original W1 rows)
IN_DIM = Z_DIM + NUM_PE_BLOCKS * BLOCK_LEN                     # 14 raw input dims

PAD = 8                                     # sublane-padded (pos|dir) group
IN_PAD = Z_DIM + PAD                        # 16 feature rows of the fused input
KENC = IN_PAD + 2 * NUM_ENC * PAD           # 80 rows of the encoded (feature-major) tile
OUT_PAD = 8                                 # padded output feature rows (6 used)


# ---------------- Pallas kernel (feature-major: features on sublanes, batch on lanes) ----
def generator_kernel(x_ref, w1f_ref, whid_ref, bh_ref, wl_ref, bl_ref, o_ref, enc_ref):
    f32, bf16 = jnp.float32, jnp.bfloat16

    x = x_ref[...]                                    # (16, TB) f32: [z(8)|X Y Z dX dY dZ 0 0]
    enc_ref[0:IN_PAD, :] = x.astype(bf16)             # z + raw pos/dir rows of the encoding

    xpd = x[Z_DIM:IN_PAD, :]                          # (8, TB): pos(3) | dir(3) | 0 | 0
    s = c = None
    for f in range(NUM_ENC):
        if f == 0:
            s, c = jnp.sin(xpd), jnp.cos(xpd)         # FREQS[0] == 1.0
        elif LOG_SAMPLING:
            # power-of-two frequencies: double-angle recurrence instead of new sin/cos polys
            s, c = 2.0 * s * c, 1.0 - 2.0 * s * s
        else:
            ang = xpd * FREQS[f]
            s, c = jnp.sin(ang), jnp.cos(ang)
        r0 = IN_PAD + 2 * PAD * f
        # one aligned (16, TB) bf16 store per frequency: [sin_f ; cos_f]
        enc_ref[r0:r0 + 2 * PAD, :] = jnp.concatenate([s, c], axis=0).astype(bf16)

    enc = enc_ref[...]                                # (80, TB) bf16, single materialization

    # h^T = W^T @ x^T: batch stays lane-dense on the MXU N axis; f32 accumulation,
    # biases are per-feature columns broadcast over lanes.
    h = jnp.dot(w1f_ref[...], enc, preferred_element_type=f32) + bh_ref[0]      # (32, TB)
    h = jnp.maximum(h, 0.0)
    h = jnp.dot(whid_ref[0], h.astype(bf16), preferred_element_type=f32) + bh_ref[1]
    h = jnp.maximum(h, 0.0)
    h = jnp.dot(whid_ref[1], h.astype(bf16), preferred_element_type=f32) + bh_ref[2]
    h = jnp.maximum(h, 0.0)
    o = jnp.dot(wl_ref[...], h.astype(bf16), preferred_element_type=f32) + bl_ref[...]
    o_ref[...] = o.astype(o_ref.dtype)                # (8, TB) lane-dense store


# ---------------- one-time weight packing (hoisted out of the forward path) --------
def _round_up(n, m):
    return ((n + m - 1) // m) * m


def _enc_row_map():
    """Original-W1 row feeding each sublane row of the fused encoded tile (-1 => zero).

    Row layout: [ z(8) | raw(8) | sin_f0(8) cos_f0(8) | ... | sin_f3(8) cos_f3(8) ],
    where within each 8-row group rows 0-2 = pos(X,Y,Z), 3-5 = dir(dX,dY,dZ), 6-7 = pad.
    """
    blk_start = [Z_DIM + b * PE_BLOCK_DIM for b in range(NUM_PE_BLOCKS)]

    def group(off):
        rows = []
        for b in range(NUM_PE_BLOCKS):
            rows += [blk_start[b] + off + r for r in range(BLOCK_LEN)]
        return rows + [-1] * (PAD - NUM_PE_BLOCKS * BLOCK_LEN)

    rows = list(range(Z_DIM))                              # z rows
    if INCLUDE_INPUT:
        rows += group(0)                                   # raw pos/dir rows
        base = BLOCK_LEN
    else:
        rows += [-1] * PAD
        base = 0
    for f in range(NUM_ENC):
        rows += group(base + 2 * BLOCK_LEN * f)                # sin_f
        rows += group(base + 2 * BLOCK_LEN * f + BLOCK_LEN)    # cos_f
    assert len(rows) == KENC
    return rows


def pack_params(params):
    """Permute+transpose W1 into the fused feature-major layout (zero cols for pad rows,
    since cos(0)=1 there), stack the hidden weights, column-ize the biases, and cast
    matmul operands to bf16 (biases stay f32).  Call ONCE; reuse across forwards."""
    w1, b1, w2, b2, w3, b3, wl, bl = params
    rows = _enc_row_map()
    w1x = jnp.concatenate([w1, jnp.zeros((1, G_DIM), w1.dtype)], axis=0)  # extra zero row
    gather = jnp.asarray([r if r >= 0 else PE_DIM for r in rows], jnp.int32)
    w1f_t = w1x[gather].T.astype(jnp.bfloat16)                            # (32, 80)
    whid_t = jnp.stack([w2.T, w3.T], axis=0).astype(jnp.bfloat16)         # (2, 32, 32)
    bh = jnp.stack([b1.reshape(G_DIM, 1), b2.reshape(G_DIM, 1),
                    b3.reshape(G_DIM, 1)], axis=0).astype(jnp.float32)    # (3, 32, 1)
    wl_t = (jnp.zeros((OUT_PAD, G_DIM), jnp.float32)
            .at[:OUT_DIM].set(wl.T).astype(jnp.bfloat16))                 # (8, 32)
    bl_col = jnp.zeros((OUT_PAD, 1), jnp.float32).at[:OUT_DIM, 0].set(bl.reshape(-1))
    return w1f_t, whid_t, bh, wl_t, bl_col


# ---------------- forward wrapper ---------------------------------------------------
def generator_pos_encoding(x, packed, *, tb=8192):
    """Forward pass of GeneratorPosEncoding.
    x: (B, 14) = [z(8), pos(3), dir(3)];  packed = pack_params(params)."""
    w1f_t, whid_t, bh, wl_t, bl_col = packed
    B = x.shape[0]

    # Lane-dense batch tile (multiple of 128); aim for >=2 grid steps so v7x megacore
    # can shard batch tiles across both TensorCores.
    b128 = _round_up(B, 128)
    TB = min(_round_up(tb, 128), max(128, _round_up(b128 // 2, 128)))
    Bp = _round_up(B, TB)

    # Single fused feature-major input: rows [z(8) | X Y Z dX dY dZ | pad(2)], lanes = batch.
    xt = jnp.pad(x.T, ((0, IN_PAD - IN_DIM), (0, Bp - B)))

    weight_bytes = (w1f_t.size * 2 + whid_t.size * 2 + bh.size * 4
                    + wl_t.size * 2 + bl_col.size * 4)
    cost = pl.CostEstimate(
        flops=2 * Bp * (KENC * G_DIM + 2 * G_DIM * G_DIM + G_DIM * OUT_PAD),
        transcendentals=2 * PAD * Bp,
        bytes_accessed=Bp * 4 * (IN_PAD + OUT_PAD) + weight_bytes,
    )

    inv2 = lambda i: (0, 0)            # grid-invariant weights (fetched once)
    inv3 = lambda i: (0, 0, 0)
    out_t = pl.pallas_call(
        generator_kernel,
        out_shape=jax.ShapeDtypeStruct((OUT_PAD, Bp), jnp.float32),
        grid=(Bp // TB,),
        in_specs=[
            pl.BlockSpec((IN_PAD, TB), lambda i: (0, i)),   # x^T (batch-tiled on lanes)
            pl.BlockSpec(w1f_t.shape, inv2),                # fused first-layer W^T
            pl.BlockSpec(whid_t.shape, inv3),               # w2^T, w3^T stacked
            pl.BlockSpec(bh.shape, inv3),                   # b1..b3 as columns
            pl.BlockSpec(wl_t.shape, inv2),                 # last-layer W^T (padded)
            pl.BlockSpec(bl_col.shape, inv2),               # last-layer bias column
        ],
        out_specs=pl.BlockSpec((OUT_PAD, TB), lambda i: (0, i)),
        scratch_shapes=[pltpu.VMEM((KENC, TB), jnp.bfloat16)],   # encoded tile, bf16, 1 pass
        compiler_params=pltpu.CompilerParams(
            dimension_semantics=("parallel",)),
        cost_estimate=cost,
    )(xt, w1f_t, whid_t, bh, wl_t, bl_col)

    return out_t[:OUT_DIM, :B].T


# ---------------- pure-JAX reference (semantics of the PyTorch forward) ------------
def _encode(blk):
    enc = [blk] if INCLUDE_INPUT else []
    for f in FREQS:
        enc.append(jnp.sin(blk * f))
        enc.append(jnp.cos(blk * f))
    return jnp.concatenate(enc, axis=-1)


def reference(x, params):
    w1, b1, w2, b2, w3, b3, wl, bl = params
    xz = x[:, :Z_DIM]
    xp = x[:, Z_DIM:Z_DIM + BLOCK_LEN]
    xd = x[:, Z_DIM + BLOCK_LEN:Z_DIM + 2 * BLOCK_LEN]
    xe = jnp.concatenate([xz, _encode(xp), _encode(xd)], axis=-1)   # (B, PE_DIM)
    h = xe @ w1 + b1
    h = jnp.maximum(h, 0.0) @ w2 + b2
    h = jnp.maximum(h, 0.0) @ w3 + b3
    return jnp.maximum(h, 0.0) @ wl + bl


# ---------------- deterministic parameter init (kaiming_normal-like) ---------------
def init_params(key):
    ks = jax.random.split(key, 8)

    def kaiming(k, fan_in, fan_out):
        return jax.random.normal(k, (fan_in, fan_out), jnp.float32) * np.sqrt(2.0 / fan_in)

    def bias(k, fan_in, n):
        bound = 1.0 / np.sqrt(fan_in)
        return jax.random.uniform(k, (1, n), jnp.float32, -bound, bound)

    w1 = kaiming(ks[0], PE_DIM, G_DIM)
    b1 = bias(ks[1], PE_DIM, G_DIM)
    w2 = kaiming(ks[2], G_DIM, G_DIM)
    b2 = bias(ks[3], G_DIM, G_DIM)
    w3 = kaiming(ks[4], G_DIM, G_DIM)
    b3 = bias(ks[5], G_DIM, G_DIM)
    wl = kaiming(ks[6], G_DIM, OUT_DIM)
    bl = bias(ks[7], G_DIM, OUT_DIM)
    return (w1, b1, w2, b2, w3, b3, wl, bl)


if __name__ == "__main__":
    key = jax.random.PRNGKey(0)
    pkey, xkey = jax.random.split(key)
    params = init_params(pkey)
    packed = pack_params(params)                # packed ONCE, reused across calls

    B = 300                                     # not a tile multiple -> exercises padding
    x = jax.random.normal(xkey, (B, IN_DIM), dtype=jnp.float32)   # (300, 14)

    ref = reference(x, params)                  # pure f32 reference

    # tolerance sized for bf16 MXU inputs through 4 layers (f32 accumulation)
    out = jax.block_until_ready(generator_pos_encoding(x, packed, tb=128))   # grid = 3
    assert out.shape == (B, OUT_DIM)
    np.testing.assert_allclose(np.asarray(out), np.asarray(ref), rtol=5e-2, atol=5e-2)

    out2 = jax.block_until_ready(generator_pos_encoding(x, packed))          # grid = 2
    np.testing.assert_allclose(np.asarray(out2), np.asarray(ref), rtol=5e-2, atol=5e-2)

    print("KERNEL_OK")
</pallas_src>

<mosaic_0001>
module attributes {stable_mosaic.version = 11 : i64} {
  func.func @generator_kernel(%arg0: i32, %arg1: memref<16x128xf32, #tpu.memory_space<vmem>>, %arg2: memref<32x80xbf16, #tpu.memory_space<vmem>>, %arg3: memref<2x32x32xbf16, #tpu.memory_space<vmem>>, %arg4: memref<3x32x1xf32, #tpu.memory_space<vmem>>, %arg5: memref<8x32xbf16, #tpu.memory_space<vmem>>, %arg6: memref<8x1xf32, #tpu.memory_space<vmem>>, %arg7: memref<8x128xf32, #tpu.memory_space<vmem>>, %arg8: memref<80x128xbf16, #tpu.memory_space<vmem>>) attributes {dimension_semantics = [#tpu.dimension_semantics<parallel>], iteration_bounds = array<i64: 3>, scalar_prefetch = 0 : i64, scratch_operands = 1 : i64, tpu.core_type = #tpu.core_type<tc>, window_params = [{transform_indices = @transform_0, window_bounds = array<i64: 16, 128>}, {pipeline_mode = #tpu.pipeline_mode<synchronous>, transform_indices = @transform_1, window_bounds = array<i64: 32, 80>}, {pipeline_mode = #tpu.pipeline_mode<synchronous>, transform_indices = @transform_2, window_bounds = array<i64: 2, 32, 32>}, {pipeline_mode = #tpu.pipeline_mode<synchronous>, transform_indices = @transform_3, window_bounds = array<i64: 3, 32, 1>}, {pipeline_mode = #tpu.pipeline_mode<synchronous>, transform_indices = @transform_4, window_bounds = array<i64: 8, 32>}, {pipeline_mode = #tpu.pipeline_mode<synchronous>, transform_indices = @transform_5, window_bounds = array<i64: 8, 1>}, {transform_indices = @transform_6, window_bounds = array<i64: 8, 128>}]} {
    %c0 = arith.constant 0 : index
    %c0_0 = arith.constant 0 : index
    %0 = vector.load %arg1[%c0, %c0_0] : memref<16x128xf32, #tpu.memory_space<vmem>>, vector<16x128xf32>
    %1 = arith.truncf %0 : vector<16x128xf32> to vector<16x128xbf16>
    %c0_1 = arith.constant 0 : index
    %c0_2 = arith.constant 0 : index
    %2 = vector.load %arg8[%c0_1, %c0_2] : memref<80x128xbf16, #tpu.memory_space<vmem>>, vector<16x128xbf16>
    tpu.vector_store %arg8[%c0_1, %c0_2], %1 {strides = array<i32>} : memref<80x128xbf16, #tpu.memory_space<vmem>>, vector<16x128xbf16>,
    %3 = vector.extract_strided_slice %0 {offsets = [8, 0], sizes = [8, 128], strides = [1, 1]} : vector<16x128xf32> to vector<8x128xf32>
    %4 = math.sin %3 : vector<8x128xf32>
    %5 = math.cos %3 : vector<8x128xf32>
    %6 = tpu.concatenate %4, %5 in 0 : vector<8x128xf32>, vector<8x128xf32> -> vector<16x128xf32>
    %7 = arith.truncf %6 : vector<16x128xf32> to vector<16x128xbf16>
    %c16 = arith.constant 16 : index
    %c0_3 = arith.constant 0 : index
    %8 = vector.load %arg8[%c16, %c0_3] : memref<80x128xbf16, #tpu.memory_space<vmem>>, vector<16x128xbf16>
    tpu.vector_store %arg8[%c16, %c0_3], %7 {strides = array<i32>} : memref<80x128xbf16, #tpu.memory_space<vmem>>, vector<16x128xbf16>,
    %cst = arith.constant 2.000000e+00 : f32
    %9 = vector.broadcast %cst : f32 to vector<8x128xf32>
    %10 = arith.mulf %9, %4 : vector<8x128xf32>
    %11 = arith.mulf %10, %5 : vector<8x128xf32>
    %cst_4 = arith.constant 2.000000e+00 : f32
    %12 = vector.broadcast %cst_4 : f32 to vector<8x128xf32>
    %13 = arith.mulf %12, %4 : vector<8x128xf32>
    %14 = arith.mulf %13, %4 : vector<8x128xf32>
    %cst_5 = arith.constant 1.000000e+00 : f32
    %15 = vector.broadcast %cst_5 : f32 to vector<8x128xf32>
    %16 = arith.subf %15, %14 : vector<8x128xf32>
    %17 = tpu.concatenate %11, %16 in 0 : vector<8x128xf32>, vector<8x128xf32> -> vector<16x128xf32>
    %18 = arith.truncf %17 : vector<16x128xf32> to vector<16x128xbf16>
    %c32 = arith.constant 32 : index
    %c0_6 = arith.constant 0 : index
    %19 = vector.load %arg8[%c32, %c0_6] : memref<80x128xbf16, #tpu.memory_space<vmem>>, vector<16x128xbf16>
    tpu.vector_store %arg8[%c32, %c0_6], %18 {strides = array<i32>} : memref<80x128xbf16, #tpu.memory_space<vmem>>, vector<16x128xbf16>,
    %cst_7 = arith.constant 2.000000e+00 : f32
    %20 = vector.broadcast %cst_7 : f32 to vector<8x128xf32>
    %21 = arith.mulf %20, %11 : vector<8x128xf32>
    %22 = arith.mulf %21, %16 : vector<8x128xf32>
    %cst_8 = arith.constant 2.000000e+00 : f32
    %23 = vector.broadcast %cst_8 : f32 to vector<8x128xf32>
    %24 = arith.mulf %23, %11 : vector<8x128xf32>
    %25 = arith.mulf %24, %11 : vector<8x128xf32>
    %cst_9 = arith.constant 1.000000e+00 : f32
    %26 = vector.broadcast %cst_9 : f32 to vector<8x128xf32>
    %27 = arith.subf %26, %25 : vector<8x128xf32>
    %28 = tpu.concatenate %22, %27 in 0 : vector<8x128xf32>, vector<8x128xf32> -> vector<16x128xf32>
    %29 = arith.truncf %28 : vector<16x128xf32> to vector<16x128xbf16>
    %c48 = arith.constant 48 : index
    %c0_10 = arith.constant 0 : index
    %30 = vector.load %arg8[%c48, %c0_10] : memref<80x128xbf16, #tpu.memory_space<vmem>>, vector<16x128xbf16>
    tpu.vector_store %arg8[%c48, %c0_10], %29 {strides = array<i32>} : memref<80x128xbf16, #tpu.memory_space<vmem>>, vector<16x128xbf16>,
    %cst_11 = arith.constant 2.000000e+00 : f32
    %31 = vector.broadcast %cst_11 : f32 to vector<8x128xf32>
    %32 = arith.mulf %31, %22 : vector<8x128xf32>
    %33 = arith.mulf %32, %27 : vector<8x128xf32>
    %cst_12 = arith.constant 2.000000e+00 : f32
    %34 = vector.broadcast %cst_12 : f32 to vector<8x128xf32>
    %35 = arith.mulf %34, %22 : vector<8x128xf32>
    %36 = arith.mulf %35, %22 : vector<8x128xf32>
    %cst_13 = arith.constant 1.000000e+00 : f32
    %37 = vector.broadcast %cst_13 : f32 to vector<8x128xf32>
    %38 = arith.subf %37, %36 : vector<8x128xf32>
    %39 = tpu.concatenate %33, %38 in 0 : vector<8x128xf32>, vector<8x128xf32> -> vector<16x128xf32>
    %40 = arith.truncf %39 : vector<16x128xf32> to vector<16x128xbf16>
    %c64 = arith.constant 64 : index
    %c0_14 = arith.constant 0 : index
    %41 = vector.load %arg8[%c64, %c0_14] : memref<80x128xbf16, #tpu.memory_space<vmem>>, vector<16x128xbf16>
    tpu.vector_store %arg8[%c64, %c0_14], %40 {strides = array<i32>} : memref<80x128xbf16, #tpu.memory_space<vmem>>, vector<16x128xbf16>,
    %c0_15 = arith.constant 0 : index
    %c0_16 = arith.constant 0 : index
    %42 = vector.load %arg8[%c0_15, %c0_16] : memref<80x128xbf16, #tpu.memory_space<vmem>>, vector<80x128xbf16>
    %c0_17 = arith.constant 0 : index
    %c0_18 = arith.constant 0 : index
    %43 = vector.load %arg2[%c0_17, %c0_18] : memref<32x80xbf16, #tpu.memory_space<vmem>>, vector<32x80xbf16>
    %cst_19 = arith.constant dense<0.000000e+00> : vector<32x128xf32>
    %44 = tpu.matmul %43, %42, %cst_19 {dimension_numbers = #tpu.dot_dimension_numbers<[1], [0], [0], [1], [0, 0, 1, 1], [], []>} : vector<32x80xbf16>, vector<80x128xbf16>, vector<32x128xf32> -> vector<32x128xf32>
    %c0_20 = arith.constant 0 : index
    %c0_21 = arith.constant 0 : index
    %c0_22 = arith.constant 0 : index
    %45 = vector.load %arg4[%c0_20, %c0_21, %c0_22] : memref<3x32x1xf32, #tpu.memory_space<vmem>>, vector<1x32x1xf32>
    %46 = vector.shape_cast %45 : vector<1x32x1xf32> to vector<32x1xf32>
    %47 = vector.broadcast %46 : vector<32x1xf32> to vector<32x128xf32>
    %48 = arith.addf %44, %47 : vector<32x128xf32>
    %cst_23 = arith.constant 0.000000e+00 : f32
    %49 = vector.broadcast %cst_23 : f32 to vector<32x128xf32>
    %50 = arith.maximumf %48, %49 : vector<32x128xf32>
    %c0_24 = arith.constant 0 : index
    %c0_25 = arith.constant 0 : index
    %c0_26 = arith.constant 0 : index
    %51 = vector.load %arg3[%c0_24, %c0_25, %c0_26] : memref<2x32x32xbf16, #tpu.memory_space<vmem>>, vector<1x32x32xbf16>
    %52 = vector.shape_cast %51 : vector<1x32x32xbf16> to vector<32x32xbf16>
    %53 = arith.truncf %50 : vector<32x128xf32> to vector<32x128xbf16>
    %cst_27 = arith.constant dense<0.000000e+00> : vector<32x128xf32>
    %54 = tpu.matmul %52, %53, %cst_27 {dimension_numbers = #tpu.dot_dimension_numbers<[1], [0], [0], [1], [0, 0, 1, 1], [], []>} : vector<32x32xbf16>, vector<32x128xbf16>, vector<32x128xf32> -> vector<32x128xf32>
    %c1 = arith.constant 1 : index
    %c0_28 = arith.constant 0 : index
    %c0_29 = arith.constant 0 : index
    %55 = vector.load %arg4[%c1, %c0_28, %c0_29] : memref<3x32x1xf32, #tpu.memory_space<vmem>>, vector<1x32x1xf32>
    %56 = vector.shape_cast %55 : vector<1x32x1xf32> to vector<32x1xf32>
    %57 = vector.broadcast %56 : vector<32x1xf32> to vector<32x128xf32>
    %58 = arith.addf %54, %57 : vector<32x128xf32>
    %cst_30 = arith.constant 0.000000e+00 : f32
    %59 = vector.broadcast %cst_30 : f32 to vector<32x128xf32>
    %60 = arith.maximumf %58, %59 : vector<32x128xf32>
    %c1_31 = arith.constant 1 : index
    %c0_32 = arith.constant 0 : index
    %c0_33 = arith.constant 0 : index
    %61 = vector.load %arg3[%c1_31, %c0_32, %c0_33] : memref<2x32x32xbf16, #tpu.memory_space<vmem>>, vector<1x32x32xbf16>
    %62 = vector.shape_cast %61 : vector<1x32x32xbf16> to vector<32x32xbf16>
    %63 = arith.truncf %60 : vector<32x128xf32> to vector<32x128xbf16>
    %cst_34 = arith.constant dense<0.000000e+00> : vector<32x128xf32>
    %64 = tpu.matmul %62, %63, %cst_34 {dimension_numbers = #tpu.dot_dimension_numbers<[1], [0], [0], [1], [0, 0, 1, 1], [], []>} : vector<32x32xbf16>, vector<32x128xbf16>, vector<32x128xf32> -> vector<32x128xf32>
    %c2 = arith.constant 2 : index
    %c0_35 = arith.constant 0 : index
    %c0_36 = arith.constant 0 : index
    %65 = vector.load %arg4[%c2, %c0_35, %c0_36] : memref<3x32x1xf32, #tpu.memory_space<vmem>>, vector<1x32x1xf32>
    %66 = vector.shape_cast %65 : vector<1x32x1xf32> to vector<32x1xf32>
    %67 = vector.broadcast %66 : vector<32x1xf32> to vector<32x128xf32>
    %68 = arith.addf %64, %67 : vector<32x128xf32>
    %cst_37 = arith.constant 0.000000e+00 : f32
    %69 = vector.broadcast %cst_37 : f32 to vector<32x128xf32>
    %70 = arith.maximumf %68, %69 : vector<32x128xf32>
    %c0_38 = arith.constant 0 : index
    %c0_39 = arith.constant 0 : index
    %71 = vector.load %arg5[%c0_38, %c0_39] : memref<8x32xbf16, #tpu.memory_space<vmem>>, vector<8x32xbf16>
    %72 = arith.truncf %70 : vector<32x128xf32> to vector<32x128xbf16>
    %cst_40 = arith.constant dense<0.000000e+00> : vector<8x128xf32>
    %73 = tpu.matmul %71, %72, %cst_40 {dimension_numbers = #tpu.dot_dimension_numbers<[1], [0], [0], [1], [0, 0, 1, 1], [], []>} : vector<8x32xbf16>, vector<32x128xbf16>, vector<8x128xf32> -> vector<8x128xf32>
    %c0_41 = arith.constant 0 : index
    %c0_42 = arith.constant 0 : index
    %74 = vector.load %arg6[%c0_41, %c0_42] : memref<8x1xf32, #tpu.memory_space<vmem>>, vector<8x1xf32>
    %75 = vector.broadcast %74 : vector<8x1xf32> to vector<8x128xf32>
    %76 = arith.addf %73, %75 : vector<8x128xf32>
    %c0_43 = arith.constant 0 : index
    %c0_44 = arith.constant 0 : index
    %77 = vector.load %arg7[%c0_43, %c0_44] : memref<8x128xf32, #tpu.memory_space<vmem>>, vector<8x128xf32>
    tpu.vector_store %arg7[%c0_43, %c0_44], %76 {strides = array<i32>} : memref<8x128xf32, #tpu.memory_space<vmem>>, vector<8x128xf32>,
    return
  }
  func.func @transform_0(%arg0: i32) -> (i32, i32) {
    %c0_i32 = arith.constant 0 : i32
    %c0_i32_0 = arith.constant 0 : i32
    return %c0_i32, %arg0 : i32, i32
  }
  func.func @transform_1(%arg0: i32) -> (i32, i32) {
    %c0_i32 = arith.constant 0 : i32
    %c0_i32_0 = arith.constant 0 : i32
    %c0_i32_1 = arith.constant 0 : i32
    return %c0_i32, %c0_i32_0 : i32, i32
  }
  func.func @transform_2(%arg0: i32) -> (i32, i32, i32) {
    %c0_i32 = arith.constant 0 : i32
    %c0_i32_0 = arith.constant 0 : i32
    %c0_i32_1 = arith.constant 0 : i32
    %c0_i32_2 = arith.constant 0 : i32
    return %c0_i32, %c0_i32_0, %c0_i32_1 : i32, i32, i32
  }
  func.func @transform_3(%arg0: i32) -> (i32, i32, i32) {
    %c0_i32 = arith.constant 0 : i32
    %c0_i32_0 = arith.constant 0 : i32
    %c0_i32_1 = arith.constant 0 : i32
    %c0_i32_2 = arith.constant 0 : i32
    return %c0_i32, %c0_i32_0, %c0_i32_1 : i32, i32, i32
  }
  func.func @transform_4(%arg0: i32) -> (i32, i32) {
    %c0_i32 = arith.constant 0 : i32
    %c0_i32_0 = arith.constant 0 : i32
    %c0_i32_1 = arith.constant 0 : i32
    return %c0_i32, %c0_i32_0 : i32, i32
  }
  func.func @transform_5(%arg0: i32) -> (i32, i32) {
    %c0_i32 = arith.constant 0 : i32
    %c0_i32_0 = arith.constant 0 : i32
    %c0_i32_1 = arith.constant 0 : i32
    return %c0_i32, %c0_i32_0 : i32, i32
  }
  func.func @transform_6(%arg0: i32) -> (i32, i32) {
    %c0_i32 = arith.constant 0 : i32
    %c0_i32_0 = arith.constant 0 : i32
    return %c0_i32, %arg0 : i32, i32
  }
}

</mosaic_0001>

<bundles_post_ra>
// kernel: tpu_custom_call.1
= control target key start
LH: loop header
LB: loop body
LE: loop exit
PB: predicated region body
PF: predicated region fallthrough
CT: control target
= control target key end

     0   :  { %11 = vsyncpa [#allocation5], 0  ;;  %s1562_s0 = inlined_call_operand.vmem [shape: f32[16,384], index: 0, kind: input, shape index: {}]   ;;  %s1563_s1 = inlined_call_operand.vmem [shape: bf16[32,80], index: 1, kind: input, shape index: {}]   ;;  %s1564_s2 = inlined_call_operand.vmem [shape: bf16[2,32,32], index: 2, kind: input, shape index: {}]   ;;  %s1565_s3 = inlined_call_operand.vmem [shape: f32[3,32,1], index: 3, kind: input, shape index: {}]   ;;  %s1566_s4 = inlined_call_operand.vmem [shape: bf16[8,32], index: 4, kind: input, shape index: {}]   ;;  %s1567_s5 = inlined_call_operand.vmem [shape: f32[8,1], index: 5, kind: input, shape index: {}]   ;;  %s1568_s6 = inlined_call_operand.hbm [shape: f32[8,384], index: 6, kind: output, shape index: {}]  }
   0x1   :  { %13 = vsyncpa [#allocation5 + $0x1], 0  ;;  %s1364_s21 = smov 0   ;;  %s1366_s22 = smov 0  }
   0x2   :  { %s1368_s23 = smov 0   ;;  %s1370_s24 = smov 0  }
   0x3 LB: > { %s1032_s25 = sadd.s32 4294967295, %s1317_s24   ;;  %s1033_s26 = sadd.s32 4294967294, %s1317_s24   ;;  %s1317_s24 = sphi %s1370_s24, %s1574_s24   ;;  %s1313_s23 = sphi %s1368_s23, %s1573_s23   ;;  %s1309_s22 = sphi %s1366_s22, %s1572_s22   ;;  %s1305_s21 = sphi %s1364_s21, %s1571_s21  }
   0x4   : > { %s1387_s27 = sadd.s32 1, %s1317_s24   ;;  %s26_s28 = sadd.s32 1, %s1313_s23 }
   0x5   : > { %s23_s29 = ssub.s32 %s1317_s24, %s1387_s27  ;;  %p33_p0 = scmp.ne.s32.totalorder %s1313_s23, %s1309_s22 }
   0x6   : > { %p24_p1 = scmp.eq.s32.totalorder %s23_s29, 0  ;;  %p34_p2 = scmp.eq.s32.totalorder %s1317_s24, 0 }
   0x7   : > { %p168_p3 = scmp.eq.s32.totalorder %s1032_s25, 2  ;;  %p173_p4 = scmp.ne.s32.totalorder %s1309_s22, %s1305_s21 }
   0x8   : > { %s1400_s30 = scalar_select %p24_p1, %s1313_s23, %s26_s28  }
   0x9   : > { %p35_p5 = por %p34_p2, %p33_p0  ;;  %p1402_p6 = por %p168_p3, %p33_p0 }
   0xa   : > { %p174_p7 = scmp.eq.s32.totalorder %s1033_s26, 2  ;;  %p1035_p9 = scmp.ge.s32.totalorder %s1317_s24, 3 }
   0xc   : > { %p1406_p8 = por %p174_p7, %p173_p4  ;;  %205 = sbr.rel (%p1035_p9) target bundleno = 22 (0x16), region = 36 }
  0x11   : > { %208 = sbr.rel (!%p35_p5) target bundleno = 22 (0x16), region = 40  ;;  %s210_s9 = sand.u32 (%p35_p5), 1, %s1313_s23  }
  0x12   : > { %s1037_s10 = sshll.u32 (%p35_p5), %s1317_s24, 3  ;;  %s1036_s11 = sshll.u32 (%p35_p5), %s210_s9, 4 }
  0x13   : > { %s214_s14 = scalar_lea.vmem (%p35_p5), %s1562_s0, %s1037_s10  ;;  %s212_s15 = scalar_lea.vmem (%p35_p5), [#allocation3], %s1036_s11 }
  0x14   : > { %v245_v0 = vld [vmem:[%s214_s14] sm:$0xff] (%p35_p5)  ;;  %v247_v1 = vld [vmem:[%s214_s14 + $0x18] sm:$0xff] (%p35_p5) }
  0x15   : > { %246 = vst [vmem:[%s212_s15] sm:$0xff] (%p35_p5), %v245_v0  ;;  %248 = vst [vmem:[%s212_s15 + $0x8] sm:$0xff] (%p35_p5), %v247_v1 }
  0x16 PF: > { %p1038_p10 = scmp.ge.s32.totalorder %s1317_s24, 1  ;;  %p253_p11 = scmp.lt.s32.totalorder %s1317_s24, 4 }
  0x18   : > { %p254_p12 = pnand %p1038_p10, %p253_p11 }
  0x19   : > { %s1419_s16 = sand.u32 (!%p254_p12), 1, %s1309_s22   ;;  %s1328_s10 = smov (!%p254_p12), [#allocation4]  }
  0x1a   : > { %257 = sbr.rel (%p254_p12) target bundleno = 1000 (0x3e8), region = 78  ;;  %s1039_s17 = sshll.u32 (!%p254_p12), %s1419_s16, 4 }
  0x1b   : > { %s262_s18 = scalar_lea.vmem (!%p254_p12), [#allocation3], %s1039_s17  ;;  %s1040_s17 = sshll.u32 (!%p254_p12), %s1419_s16, 3 }
  0x1c   : > { %s288_s19 = scalar_lea.vmem (!%p254_p12), [#allocation4], %s1040_s17  ;;  %s955_s9 = scalar_lea.sflag (!%p254_p12), [#allocation5], %s1419_s16 }
  0x1d   : > { %s968_s20 = sshll.u32 (!%p254_p12), %s288_s19, 4  ;;  %s1261_s11 = sshll.u32 (!%p254_p12), %s1328_s10, 4  ;;  %s1522_s20 = int_to_ptr.vmem [resolvable:$true] %s968_s20  ;;  %s1262_s11 = int_to_ptr.vmem [resolvable:$false] %s1261_s11 }
  0x1e   : > { %s1263_s12 = scalar_lea.vmem (!%p254_p12), %s1262_s11, 256  ;;  %p1264_p2 = scmp.lt.s32.totalorder (!%p254_p12), %s1522_s20, %s1262_s11 }
  0x1f   : > { %v1422_v2 = vld [vmem:[%s262_s18 + $0x8] sm:$0xff]  ;;  %v290_v3 = vld [vmem:[%s262_s18] sm:$0xff]  ;;  %vm639_vm0 = vcmask 654336   ;;  %v1319_v11 = vmov 0   ;;  %v1320_v24 = vmov 683565275  }
  0x20   : > { %v305_v4 = vand.u32 2139095040, %v1422_v2  ;;  %v1106_v5 = vpack.c.bf16 %v1422_v2, %v290_v3  ;;  %v1247_v6 = vld [vmem:[%s1563_s1] sm:$0xff]   ;;  %v302_v8 = vand.u32 2147483647, %v1422_v2  ;;  %v577_v9 = vld [vmem:[%s1565_s3 + $0x10] sm:$0xff]  ;;  %1240 = vset.pattern.permute.xlu0 %v1319_v11  ;;  %1241 = vset.pattern.permute.xlu1 %v1319_v11  ;;  %v578_v14 = vld [vmem:[%s1565_s3 + $0x18] sm:$0xff] }
  0x21   : > { %1160 = vmatprep.mubr.msk.bf16.mxu0 %vm639_vm0, %v1247_v6  ;;  %v575_v12 = vld [vmem:[%s1565_s3] sm:$0xff]  ;;  %591 = vperm.xlu0 %1240, %v577_v9   ;;  %v576_v15 = vld [vmem:[%s1565_s3 + $0x8] sm:$0xff]  ;;  %v1070_v18 = vld [vmem:[%s1565_s3 + $0x30] sm:$0xff]  ;;  %v1321_v26 = vmov 2475754826   ;;  %vm304_vm8 = vcmp.lt.s32.totalorder %v1422_v2, 0 }
  0x22   : > { %v306_v7 = vshrl.u32 %v305_v4, 23  ;;  %1107 = vst [vmem:[#allocation2] sm:$0xff] %v1106_v5   ;;  %581 = vperm.xlu1 %1241, %v575_v12   ;;  %v309_v16 = vand.u32 8388607, %v302_v8  ;;  %v1071_v20 = vld [vmem:[%s1565_s3 + $0x38] sm:$0xff]  ;;  %v1068_v38 = vld [vmem:[%s1565_s3 + $0x20] sm:$0xff] }
  0x23   : > { %v1322_v28 = vmov 2131351028   ;;  %v1323_v30 = vmov 2102212464   ;;  %v1324_v32 = vmov 920167782  }
  0x24   : > { %v1043_v10 = vadd.s32 4294967169, %v306_v7  ;;  %v310_v21 = vor.u32 8388608, %v309_v16  ;;  %v1069_v39 = vld [vmem:[%s1565_s3 + $0x28] sm:$0xff]  ;;  %v1325_v41 = vmov 1326507024   ;;  %v1082_v53 = vld [vmem:[%s1565_s3 + $0x50] sm:$0xff] }
  0x25   : > { %596 = vperm.xlu0 %1240, %v578_v14   ;;  %v1083_v54 = vld [vmem:[%s1565_s3 + $0x58] sm:$0xff]  ;;  %v1080_v4 = vld [vmem:[%s1565_s3 + $0x40] sm:$0xff]  ;;  %v1081_v5 = vld [vmem:[%s1565_s3 + $0x48] sm:$0xff]  ;;  %vm303_vm9 = vcmp.le.f32.partialorder %v302_v8, 0.7853982  ;;  %s1090_s18 = sshll.u32 %s1032_s25, 7 }
  0x26   : > { %v312_v13 = vadd.s32 1, %v1043_v10  ;;  %586 = vperm.xlu1 %1241, %v576_v15   ;;  %v350_v43 = vshll.u32 %v310_v21, 8  ;;  %v904_v9 = vld [vmem:[%s1567_s5] sm:$0xff]  ;;  %s1520_s29 = scalar_lea.hbm %s1568_s6, %s1090_s18  ;;  %s1257_s25 = scalar_lea.vmem %s1522_s20, 128 }
  0x27   : > { %p1258_p13 = scmp.ne.s32.totalorder %s1522_s20, %s1257_s25  ;;  %p1265_p3 = scmp.lt.s32.totalorder %s1263_s12, %s1257_s25 }
  0x28   : > { %vm313_vm1 = vcmp.gt.s32.totalorder %v312_v13, 0 }
  0x29   : > { %v314_v17 = vsel %vm313_vm1, %v312_v13, 0  ;;  %722 = vperm.xlu0 %1240, %v1070_v18   ;;  %vm394_vm1 = vweird.f32 %v1422_v2  ;;  %p1259_p0 = pnand %p1258_p13, %p1402_p6  ;;  %p1266_p4 = por %p1265_p3, %p1264_p2 }
  0x2a   : > { %v316_v19 = vand.u32 31, %v314_v17  ;;  %v315_v22 = vshrl.u32 %v314_v17, 5  ;;  %727 = vperm.xlu1 %1241, %v1071_v20  }
  0x2b   : > { %p1260_p1 = pneg %p1259_p0 }
  0x2c   : > { %v317_v23 = vsub.s32 32, %v316_v19  ;;  %v319_v25 = vshll.u32 %v1320_v24, %v316_v19  ;;  %v322_v27 = vshll.u32 %v1321_v26, %v316_v19  ;;  %v325_v29 = vshll.u32 %v1322_v28, %v316_v19 }
  0x2d   : > { %v328_v31 = vshll.u32 %v1323_v30, %v316_v19  ;;  %v331_v33 = vshll.u32 %v1324_v32, %v316_v19  ;;  %vm334_vm2 = vcmp.lt.s32.totalorder %v315_v22, 1  ;;  %vm337_vm3 = vcmp.lt.s32.totalorder %v315_v22, 4  ;;  %712 = vperm.xlu0 %1240, %v1068_v38   ;;  %p1267_p5 = pnand %p1266_p4, %p1260_p1 }
  0x2e   : > { %v318_v34 = vshrl.u32 %v1320_v24, %v317_v23  ;;  %v320_v35 = vshrl.u32 %v1321_v26, %v317_v23  ;;  %v323_v36 = vshrl.u32 %v1322_v28, %v317_v23  ;;  %v326_v37 = vshrl.u32 %v1323_v30, %v317_v23  ;;  %717 = vperm.xlu1 %1241, %v1069_v39  }
  0x2f   : > { %v329_v40 = vshrl.u32 %v1324_v32, %v317_v23  ;;  %v332_v42 = vshrl.u32 %v1325_v41, %v317_v23  ;;  %vm335_vm4 = vcmp.lt.s32.totalorder %v315_v22, 2  ;;  %vm336_vm5 = vcmp.lt.s32.totalorder %v315_v22, 3 }
  0x30   : > { %v321_v44 = vor.u32 %v320_v35, %v319_v25  ;;  %v324_v45 = vor.u32 %v323_v36, %v322_v27  ;;  %v327_v46 = vor.u32 %v326_v37, %v325_v29 }
  0x31   : > { %v330_v47 = vor.u32 %v329_v40, %v328_v31  ;;  %v333_v48 = vor.u32 %v332_v42, %v331_v33  ;;  %824 = vperm.xlu0 %1240, %v1082_v53  }
  0x32   : > { %v338_v49 = vsel %vm334_vm2, %v318_v34, %v321_v44  ;;  %v339_v50 = vsel %vm337_vm3, %v327_v46, 2102212464  ;;  %v342_v51 = vsel %vm334_vm2, %v321_v44, %v324_v45  ;;  %v346_v52 = vsel %vm334_vm2, %v324_v45, %v327_v46  ;;  %829 = vperm.xlu1 %1241, %v1083_v54  }
  0x33   : > { %v340_v55 = vsel %vm336_vm5, %v324_v45, %v339_v50  ;;  %v343_v56 = vsel %vm337_vm3, %v330_v47, 920167782  ;;  %v347_v57 = vsel %vm337_vm3, %v333_v48, 1326507024  ;;  %vm740_vm2 = vcmask 261120  }
  0x34   : > { %v344_v58 = vsel %vm336_vm5, %v327_v46, %v343_v56  ;;  %v348_v59 = vsel %vm336_vm5, %v330_v47, %v347_v57  ;;  %v341_v60 = vsel %vm335_vm4, %v338_v49, %v340_v55 }
  0x35   : > { %v345_v61 = vsel %vm335_vm4, %v342_v51, %v344_v58  ;;  %v349_v62 = vsel %vm335_vm4, %v346_v52, %v348_v59  ;;  %v357_v6 = vmul.u32 %v350_v43, %v341_v60  ;;  %814 = vperm.xlu0 %1240, %v1080_v4  }
  0x36   : > { %v1466_v63 = vmul.u32.u64.low %v350_v43, %v349_v62  ;;  %v1467_v0 = vmul.u32.u64.high %v350_v43, %v349_v62, %v1466_v63  ;;  %v1469_v1 = vmul.u32.u64.low %v350_v43, %v345_v61  ;;  %v1470_v3 = vmul.u32.u64.high %v350_v43, %v345_v61, %v1469_v1  ;;  %819 = vperm.xlu1 %1241, %v1081_v5  }
  0x38   : > { %vm359_vm6 = vc.u32 %v1467_v0, %v1469_v1  ;;  %v360_v7 = vadd.s32 1, %v1470_v3  ;;  %v358_v20 = vadd.s32 %v1469_v1, %v1467_v0 }
  0x39   : > { %907 = vperm.xlu0 %1240, %v904_v9  }
  0x3a   : > { %v361_v10 = vsel %vm359_vm6, %v360_v7, %v1470_v3 }
  0x3b   : > { %v362_v11 = vadd.s32 %v361_v10, %v357_v6  ;;  %v1246_v10 = vld [vmem:[#allocation2] sm:$0xff]  }
  0x3d   : > { %v363_v12 = vadd.s32 536870912, %v362_v11 }
  0x3f   : > { %v364_v13 = vshrl.u32 %v363_v12, 30  ;;  %v1249_v12 = vld [vmem:[%s1564_s2] sm:$0xff]  }
  0x40   : > { %1168 = vmatprep.mubr.msk.bf16.mxu1 %vm740_vm2, %v1249_v12 }
  0x41   : > { %v365_v14 = vshll.u32 %v364_v13, 30  ;;  %v388_v33 = vsub.s32 4, %v364_v13 }
  0x43   : > { %v366_v15 = vsub.s32 %v362_v11, %v365_v14  ;;  %v389_v36 = vsel %vm304_vm8, %v388_v33, %v364_v13  ;;  %v1248_v11 = vld [vmem:[%s1563_s1 + $0x8] sm:$0xff]  }
  0x44   : > { %v391_v38 = vsel %vm303_vm9, 0, %v389_v36 }
  0x45   : > { %v368_v16 = vsub.s32 0, %v366_v15  ;;  %v395_v39 = vadd.s32 3, %v391_v38  ;;  %v499_v41 = vand.u32 3, %v391_v38 }
  0x47   : > { %v1044_v17 = vmin.u32 %v368_v16, %v366_v15  ;;  %v396_v40 = vand.u32 3, %v395_v39  ;;  %vm504_vm11 = vcmp.eq.s32.totalorder %v499_v41, 2  ;;  %vm501_vm13 = vcmp.eq.s32.totalorder %v499_v41, 0 }
  0x48   : > { %vm500_vm15 = vcmp.lt.s32.totalorder %v499_v41, 2 }
  0x49   : > { %v370_v18 = vclz %v1044_v17  ;;  %vm401_vm10 = vcmp.eq.s32.totalorder %v396_v40, 2  ;;  %vm398_vm12 = vcmp.eq.s32.totalorder %v396_v40, 0  ;;  %vm397_vm14 = vcmp.lt.s32.totalorder %v396_v40, 2 }
  0x4b   : > { %v1045_v19 = vadd.s32 4294967294, %v370_v18 }
  0x4d   : > { %vm1046_vm7 = vcmp.lt.s32.totalorder %v1045_v19, 0 }
  0x4e   : > { %v373_v21 = vsel %vm1046_vm7, 0, %v1045_v19 }
  0x4f   : > { %v374_v22 = vsub.s32 32, %v373_v21  ;;  %v375_v23 = vshll.u32 %v366_v15, %v373_v21  ;;  %v378_v24 = vsub.s32 4294967266, %v373_v21 }
  0x51   : > { %v376_v25 = vshrl.u32 %v358_v20, %v374_v22  ;;  %v379_v26 = vadd.s32 127, %v378_v24 }
  0x53   : > { %v377_v27 = vor.u32 %v376_v25, %v375_v23  ;;  %v380_v28 = vshll.u32 %v379_v26, 23 }
  0x55   : > { %v381_v29 = vor.u32 4788187, %v380_v28  ;;  %v384_v30 = vcvt.s32.f32 %v377_v27 }
  0x57   : > { %v382_v31 = vand.u32 2147483647, %v381_v29 }
  0x59   : > { %v385_v32 = vmul.f32 %v384_v30, %v382_v31  ;;  %v1250_v31 = vld [vmem:[%s1564_s2 + $0x8] sm:$0xff]  }
  0x5b   : > { %v386_v34 = vxor.u32 2147483648, %v385_v32 }
  0x5d   : > { %v387_v35 = vsel %vm304_vm8, %v386_v34, %v385_v32  ;;  %v1251_v32 = vld [vmem:[%s1564_s2 + $0x10] sm:$0xff]  }
  0x5e   : > { %v390_v37 = vsel %vm303_vm9, %v1422_v2, %v387_v35 }
  0x5f   : > { %1253 = vcosq.f32 %v390_v37 }
  0x60   : > { %1255 = vsinq.f32 %v390_v37 }
  0x6c   : > { %v1254_v42 = vpop.eup %1253 }
  0x6d   : > { %v1256_v43 = vpop.eup %1255  ;;  %v402_v44 = vxor.u32 2147483648, %v1254_v42 }
  0x6e   : > { %v399_v8 = vxor.u32 2147483648, %v1256_v43 }
  0x6f   : > { %v403_v45 = vsel %vm401_vm10, %v402_v44, %v1256_v43  ;;  %v506_v46 = vsel %vm504_vm11, %v402_v44, %v1256_v43 }
  0x70   : > { %v400_v47 = vsel %vm398_vm12, %v1254_v42, %v399_v8  ;;  %v503_v48 = vsel %vm501_vm13, %v1254_v42, %v399_v8 }
  0x71   : > { %v404_v49 = vsel %vm397_vm14, %v400_v47, %v403_v45  ;;  %v507_v50 = vsel %vm500_vm15, %v503_v48, %v506_v46 }
  0x72   : > { %v405_v51 = vsel %vm394_vm1, nan, %v404_v49  ;;  %v508_v52 = vsel %vm394_vm1, nan, %v507_v50  ;;  %v1252_v50 = vld [vmem:[%s1564_s2 + $0x18] sm:$0xff]  }
  0x73   : > { %v519_v53 = vmul.f32 2.0, %v405_v51  ;;  %v1111_v54 = vpack.c.bf16 %v508_v52, %v405_v51 }
  0x75   : > { %v520_v55 = vmul.f32 %v519_v53, %v508_v52  ;;  %v521_v56 = vmul.f32 %v519_v53, %v405_v51  ;;  %1128 = vst [vmem:[#allocation2 + $0x8] sm:$0xff] %v1111_v54   ;;  %v1326_v51 = vmov 0.0  }
  0x77   : > { %v522_v57 = vsub.f32 1.0, %v521_v56  ;;  %v533_v58 = vmul.f32 2.0, %v520_v55 }
  0x79   : > { %v534_v59 = vmul.f32 %v533_v58, %v522_v57  ;;  %v535_v60 = vmul.f32 %v533_v58, %v520_v55  ;;  %v1116_v61 = vpack.c.bf16 %v522_v57, %v520_v55 }
  0x7b   : > { %v536_v62 = vsub.f32 1.0, %v535_v60  ;;  %v547_v2 = vmul.f32 2.0, %v534_v59  ;;  %1129 = vst [vmem:[#allocation2 + $0x10] sm:$0xff] %v1116_v61  }
  0x7c   : > { %v1245_v9 = vld [vmem:[#allocation2 + $0x8] sm:$0xff]  }
  0x7d   : > { %v548_v63 = vmul.f32 %v547_v2, %v536_v62  ;;  %v549_v0 = vmul.f32 %v547_v2, %v534_v59  ;;  %v1121_v1 = vpack.c.bf16 %v536_v62, %v534_v59 }
  0x7f   : > { %v550_v3 = vsub.f32 1.0, %v549_v0  ;;  %1130 = vst [vmem:[#allocation2 + $0x18] sm:$0xff] %v1121_v1  }
  0x81   : > { %v1126_v4 = vpack.c.bf16 %v550_v3, %v548_v63 }
  0x82   : > { %v1244_v7 = vld [vmem:[#allocation2 + $0x10] sm:$0xff]  }
  0x83   : > { %1131 = vst [vmem:[#allocation2 + $0x20] sm:$0xff] %v1126_v4  }
  0x86   : > { %v1243_v5 = vld [vmem:[#allocation2 + $0x18] sm:$0xff]  }
  0x8a   : > { %v1242_v6 = vld [vmem:[#allocation2 + $0x20] sm:$0xff]  }
  0x8b   : > { %1150 = vmatprep.subr.bf16.mxu0 %v1242_v6 }
  0x8c   : > { %1151 = vmatpush3.bf16.msra.mxu0 %v1242_v6  ;;  %v901_v6 = vld [vmem:[%s1566_s4] sm:$0xf] }
  0x8d   : > { %1152 = vmatprep.subr.bf16.mxu0 %v1243_v5 }
  0x90   : > { %1153 = vmatpush3.bf16.msra.mxu0 %v1243_v5 }
  0x91   : > { %1154 = vmatprep.subr.bf16.mxu0 %v1244_v7 }
  0x94   : > { %1155 = vmatpush3.bf16.msra.mxu0 %v1244_v7 }
  0x95   : > { %1156 = vmatprep.subr.bf16.mxu0 %v1245_v9 }
  0x98   : > { %1157 = vmatpush3.bf16.msra.mxu0 %v1245_v9 }
  0x99   : > { %1158 = vmatprep.subr.bf16.mxu0 %v1246_v10 }
  0x9c   : > { %1159 = vmatpush3.bf16.msra.mxu0 %v1246_v10  ;;  %v592_v13 = vpop.permute.xlu0 %591 }
  0x9d   : > { %v582_v14 = vpop.permute.xlu1 %581 }
  0x9f   : > { %1161 = vmatmul.mubr.msk.bf16.vlgmr.msra.gmra.mxu0 %vm639_vm0, %v1248_v11  ;;  %vm1327_vm0 = vmmov 0  }
  0xa0   : > { %v597_v18 = vpop.permute.xlu0 %596 }
  0xa1   : > { %v587_v22 = vpop.permute.xlu1 %586 }
  0xa4   : > { %v723_v33 = vpop.permute.xlu0 %722 }
  0xa5   : > { %v728_v34 = vpop.permute.xlu1 %727 }
  0xa8   : > { %v713_v38 = vpop.permute.xlu0 %712 }
  0xa9   : > { %v718_v42 = vpop.permute.xlu1 %717 }
  0xac   : > { %v825_v52 = vpop.permute.xlu0 %824 }
  0xad   : > { %v830_v53 = vpop.permute.xlu1 %829 }
  0xb0   : > { %v815_v58 = vpop.permute.xlu0 %814 }
  0xb1   : > { %v820_v60 = vpop.permute.xlu1 %819 }
  0xb4   : > { %v908_v7 = vpop.permute.xlu0 %907 }
 0x15f   : > { %v1162_v15 = vpop.f32.mrf.mxu0 }
 0x160   : > { %v689_v17 = vadd.f32 %v1162_v15, %v592_v13 }
 0x161   : > { %v680_v16 = vpop.f32.mrf.mxu0 }
 0x162   : > { %v681_v20 = vadd.f32 %v680_v16, %v582_v14  ;;  %v697_v24 = vmax.f32 %v689_v17, 0.0 }
 0x163   : > { %v1163_v19 = vpop.f32.mrf.mxu0 }
 0x164   : > { %v692_v21 = vadd.f32 %v1163_v19, %v597_v18  ;;  %v695_v27 = vmax.f32 %v681_v20, 0.0 }
 0x165   : > { %v683_v23 = vpop.f32.mrf.mxu0 }
 0x166   : > { %v698_v25 = vmax.f32 %v692_v21, 0.0  ;;  %v684_v26 = vadd.f32 %v683_v23, %v587_v22 }
 0x168   : > { %v696_v28 = vmax.f32 %v684_v26, 0.0  ;;  %v704_v29 = vpack.c.bf16 %v698_v25, %v697_v24 }
 0x16a   : > { %v703_v30 = vpack.c.bf16 %v696_v28, %v695_v27  ;;  %1164 = vmatprep.subr.bf16.mxu1 %v704_v29 }
 0x16b   : > { %1165 = vmatpush3.bf16.msra.mxu1 %v704_v29 }
 0x16c   : > { %1166 = vmatprep.subr.bf16.mxu1 %v703_v30 }
 0x16f   : > { %1167 = vmatpush3.bf16.msra.mxu1 %v703_v30 }
 0x172   : > { %1169 = vmatmul.mubr.msk.bf16.vlgmr.msra.gmra.mxu1 %vm740_vm2, %v1250_v31 }
 0x173   : > { %1176 = vmatprep.mubr.msk.bf16.mxu1 %vm740_vm2, %v1251_v32 }
 0x232   : > { %v1170_v35 = vpop.f32.mrf.mxu1 }
 0x233   : > { %v790_v37 = vadd.f32 %v1170_v35, %v723_v33 }
 0x234   : > { %v781_v36 = vpop.f32.mrf.mxu1 }
 0x235   : > { %v782_v40 = vadd.f32 %v781_v36, %v713_v38  ;;  %v798_v44 = vmax.f32 %v790_v37, 0.0 }
 0x236   : > { %v1171_v39 = vpop.f32.mrf.mxu1 }
 0x237   : > { %v793_v41 = vadd.f32 %v1171_v39, %v728_v34  ;;  %v796_v46 = vmax.f32 %v782_v40, 0.0 }
 0x238   : > { %v784_v43 = vpop.f32.mrf.mxu1 }
 0x239   : > { %v799_v8 = vmax.f32 %v793_v41, 0.0  ;;  %v785_v45 = vadd.f32 %v784_v43, %v718_v42 }
 0x23b   : > { %v806_v47 = vpack.c.bf16 %v799_v8, %v798_v44  ;;  %v797_v48 = vmax.f32 %v785_v45, 0.0 }
 0x23d   : > { %v805_v49 = vpack.c.bf16 %v797_v48, %v796_v46  ;;  %1172 = vmatprep.subr.bf16.mxu1 %v806_v47 }
 0x23e   : > { %1173 = vmatpush3.bf16.msra.mxu1 %v806_v47 }
 0x23f   : > { %1174 = vmatprep.subr.bf16.mxu1 %v805_v49 }
 0x242   : > { %1175 = vmatpush3.bf16.msra.mxu1 %v805_v49 }
 0x243   : > { %1180 = vmatprep.subr.bf16.mxu1 %v1326_v51 }
 0x245   : > { %1177 = vmatmul.mubr.msk.bf16.vlgmr.msra.gmra.mxu1 %vm740_vm2, %v1252_v50 }
 0x246   : > { %1184 = vmatprep.mubr.msk.bf16.mxu1 %vm1327_vm0, %v1326_v51 }
 0x305   : > { %v1178_v54 = vpop.f32.mrf.mxu1 }
 0x306   : > { %v891_v56 = vadd.f32 %v1178_v54, %v825_v52 }
 0x307   : > { %v882_v55 = vpop.f32.mrf.mxu1 }
 0x308   : > { %v899_v62 = vmax.f32 %v891_v56, 0.0  ;;  %v883_v2 = vadd.f32 %v882_v55, %v815_v58 }
 0x309   : > { %v1179_v57 = vpop.f32.mrf.mxu1 }
 0x30a   : > { %v894_v59 = vadd.f32 %v1179_v57, %v830_v53  ;;  %v897_v4 = vmax.f32 %v883_v2, 0.0 }
 0x30b   : > { %v885_v61 = vpop.f32.mrf.mxu1 }
 0x30c   : > { %v900_v63 = vmax.f32 %v894_v59, 0.0  ;;  %v886_v0 = vadd.f32 %v885_v61, %v820_v60 }
 0x30e   : > { %v903_v1 = vpack.c.bf16 %v900_v63, %v899_v62  ;;  %v898_v3 = vmax.f32 %v886_v0, 0.0 }
 0x310   : > { %1181 = vmatpush3.bf16.msra.mxu1 %v903_v1  ;;  %v902_v5 = vpack.c.bf16 %v898_v3, %v897_v4 }
 0x311   : > { %1182 = vmatprep.subr.bf16.mxu1 %v1326_v51 }
 0x314   : > { %1183 = vmatpush3.bf16.msra.mxu1 %v902_v5 }
 0x317   : > { %1185 = vmatmul.mubr.msk.bf16.vlgmr.msra.gmra.mxu1 %vm740_vm2, %v901_v6 }
 0x3d7   : > { %v947_v9 = vpop.f32.mrf.mxu1 }
 0x3d8   : > { %v948_v10 = vadd.f32 %v947_v9, %v908_v7 }
 0x3d9   : > { %v1186_v11 = vpop.f32.mrf.mxu1 }
 0x3da   : > { %953 = vst [vmem:[%s288_s19] sm:$0xff] %v948_v10 }
 0x3db   : > { %v950_v12 = vpop.f32.mrf.mxu1 }
 0x3dc   : > { %1270 = shalt.err (!%p1267_p5)
}
 0x3dd   : > { %s1271_s13 = scalar_lea.hbm %s1520_s29, 128  ;;  %s1275_s15 = scalar_lea.hbm %s1568_s6, 384 }
 0x3de   : > { %p1272_p7 = scmp.ne.s32.totalorder %s1520_s29, %s1271_s13  ;;  %p1276_p11 = scmp.lt.s32.totalorder %s1520_s29, %s1568_s6 }
 0x3df   : > { %p1277_p12 = scmp.lt.s32.totalorder %s1275_s15, %s1271_s13 }
 0x3e0   : > { %p1273_p9 = pnand %p1272_p7, %p1402_p6 }
 0x3e1   : > { %p1278_p13 = por %p1277_p12, %p1276_p11 }
 0x3e2   : > { %p1274_p10 = pneg %p1273_p9 }
 0x3e4   : > { %p1279_p0 = pnand %p1278_p13, %p1274_p10 }
 0x3e6   : > { %1282 = shalt.err (!%p1279_p0)
}
 0x3e7   : > { %1192 = dma.vmem_to_hbm [thread:$0]  (%p1402_p6), %s1522_s20, 128, %s1520_s29, %s955_s9   ;;  %v1187_v13 = vpop.f32.mrf.mxu1 }
 0x3e8 PF: > { %p1198_p1 = scmp.ge.s32.totalorder %s1317_s24, 2  ;;  %s980_s19 = sand.u32 1, %s1305_s21  }
 0x3e9   : > { %s981_s26 = scalar_lea.sflag [#allocation5], %s980_s19 }
 0x3ea   : > { %p1195_p2 = pnand %p1198_p1, %p1406_p8 }
 0x3ec   : > { %p1196_p3 = pneg %p1195_p2 }
 0x3ee   : > { %1300 = dma.done.wait (%p1196_p3), %s981_s26, 128  }
 0x3ef   : > { %1302 = vsyncadd (%p1196_p3), %s981_s26, 4294967168  ;;  %p16_p4 = scmp.ge.s32.totalorder %s1387_s27, 5   ;;  %s1571_s21 = smov %s1309_s22 }
 0x3f0   : > { %s1572_s22 = smov %s1313_s23  ;;  %s1573_s23 = smov %s1400_s30 }
 0x3f1   : > { %s1574_s24 = smov %s1387_s27  ;;  %18 = sbr.rel (!%p16_p4) target bundleno = 3 (0x3), region = 125 }
 0x3f6   :  { %986 = vsyncpa [#allocation5], 1 }
 0x3f7   :  { %988 = vsyncpa [#allocation5 + $0x1], 1 }

</bundles_post_ra>
